<compile_context>
chip_gen: v7x
topology: tpu7x:2x2x1
jax: 0.10.0
libtpu: 0.0.40
codegen_flags: <defaults>
</compile_context>

<pallas_src>
import functools

import jax
import jax.numpy as jnp
from jax.experimental import pallas as pl
from jax.experimental.pallas import tpu as pltpu

# nn.CosineSimilarity(dim=1, eps=1e-08) clamps |a|*|p| at 1e-8; clamping each
# squared norm at 1e-8 (i.e. each norm at 1e-4) matches for all non-degenerate
# rows.  # TODO(synk): exact eps semantics differ only for near-zero-norm rows.
_EPS_SQ = 1e-8


def _ntxent_kernel(a_ref, p_ref, ptn_ref, out_ref, *,
                   temperature, batch_len, tile_m):
    """One row-tile of the NT-Xent loss.

    a_ref  : (TM, E)  anchor rows (input dtype)
    p_ref  : (TM, E)  matching poss rows (input dtype) -- exact f32 diagonal
    ptn_ref: (E, B)   wrapper-normalized poss^T, resident whole-array in VMEM
    out_ref: (8, 128) per-tile partials: [0,0]=loss, [0,1]=diag, [0,2]=off_mean
    """
    B = batch_len
    TM = tile_m
    inv_t = 1.0 / float(temperature)

    a = a_ref[...].astype(jnp.float32)                                      # (TM, E)
    p = p_ref[...].astype(jnp.float32)                                      # (TM, E)

    ragged = (B % TM) != 0
    if ragged:
        rows = pl.program_id(0) * TM + jax.lax.broadcasted_iota(jnp.int32, (TM, 1), 0)
        valid = rows < B
        a = jnp.where(valid, a, 0.0)
        p = jnp.where(valid, p, 0.0)

    # Row-normalize (normalize-before-matmul: no (B,B) denominator pass).
    a_n = a * jax.lax.rsqrt(jnp.maximum(jnp.sum(a * a, -1, keepdims=True), _EPS_SQ))
    p_n = p * jax.lax.rsqrt(jnp.maximum(jnp.sum(p * p, -1, keepdims=True), _EPS_SQ))

    # Diagonal cosine similarity, computed directly in f32 (no (B,B) mask).
    diag = jnp.sum(a_n * p_n, axis=-1, keepdims=True)                       # (TM, 1)

    # Fold 1/T into the (TM,E) LHS so the (TM,B) slab needs no extra multiply.
    a_s = (a_n * inv_t).astype(ptn_ref.dtype)
    sim_s = jnp.dot(a_s, ptn_ref[...],
                    preferred_element_type=jnp.float32)                     # (TM, B) == sim / T

    # Log-form loss: -log(exp(diag/T)/den) == log(den) - diag/T.
    den = jnp.sum(jnp.exp(sim_s), axis=-1, keepdims=True)                   # (TM, 1)
    loss_rows = jnp.log(den) - diag * inv_t                                 # (TM, 1)

    row_sum = jnp.sum(sim_s, axis=-1, keepdims=True) * float(temperature)   # (TM, 1)
    off_mean = (row_sum - diag) * (1.0 / max(B - 1, 1))                     # (TM, 1)

    if ragged:
        loss_rows = jnp.where(valid, loss_rows, 0.0)
        diag = jnp.where(valid, diag, 0.0)
        off_mean = jnp.where(valid, off_mean, 0.0)

    loss_sum = jnp.sum(loss_rows)
    diag_sum = jnp.sum(diag)
    off_sum = jnp.sum(off_mean)

    # Lane-dense per-tile partials (distinct output block per grid step -> the
    # grid axis can be "parallel"; wrapper reduces across tiles).
    sub = jax.lax.broadcasted_iota(jnp.int32, (8, 128), 0)
    lane = jax.lax.broadcasted_iota(jnp.int32, (8, 128), 1)
    first = sub == 0
    out_ref[...] = (jnp.where(first & (lane == 0), loss_sum, 0.0)
                    + jnp.where(first & (lane == 1), diag_sum, 0.0)
                    + jnp.where(first & (lane == 2), off_sum, 0.0))


def ntxent(anchors: jax.Array, poss: jax.Array, temperature: float = 0.25,
           use_bf16_matmul: bool = False):
    """Pallas NT-Xent. Returns (mean_loss, cos_an_pos_mean, cos_an_neg_mean)."""
    assert anchors.shape == poss.shape and anchors.ndim == 2
    B, E = anchors.shape

    # Pad E (MXU contraction dim) to a multiple of 128; zero columns are free
    # for cosine similarity.
    E_pad = max(128, ((E + 127) // 128) * 128)
    if E_pad != E:
        pad = ((0, 0), (0, E_pad - E))
        anchors = jnp.pad(anchors, pad)
        poss = jnp.pad(poss, pad)

    if use_bf16_matmul:
        mxu_dtype = jnp.bfloat16
    else:
        # bf16 inputs -> bf16 MXU operands (f32 accumulate); f32 stays f32 to
        # hold the 1e-4 tolerance (exp(x/T) amplifies bf16 operand rounding).
        mxu_dtype = jnp.bfloat16 if anchors.dtype == jnp.bfloat16 else jnp.float32

    # Normalize poss once in the wrapper (one XLA rsqrt-scale on (B,E)) and
    # pre-transpose so the MXU contraction is the natural (TM,E)x(E,B).
    p32 = poss.astype(jnp.float32)
    inv_n = jax.lax.rsqrt(jnp.maximum(jnp.sum(p32 * p32, axis=-1, keepdims=True), _EPS_SQ))
    poss_nt = jnp.swapaxes(p32 * inv_n, 0, 1).astype(mxu_dtype)             # (E_pad, B)

    # Scoped-VMEM limit: ~7/8 of physical, capped at 100 MiB (=> ~56 MiB on
    # v7x's 64 MiB parts, 100 MiB on v5e/v6e's 128 MiB parts).
    try:
        vmem_cap = int(pltpu.get_tpu_info().vmem_capacity_bytes)
    except Exception:
        vmem_cap = 64 * 1024 * 1024
    vmem_limit = min(vmem_cap * 7 // 8, 100 * 1024 * 1024)

    in_bytes = anchors.dtype.itemsize
    mxu_bytes = jnp.dtype(mxu_dtype).itemsize

    def footprint(tm):
        resident = E_pad * B * mxu_bytes                  # whole-array RHS (1 copy)
        row_tiles = 4 * tm * E_pad * in_bytes             # 2 inputs x double-buffer
        slabs = 2 * tm * B * 4                            # (TM,B) sim + exp transients
        return resident + row_tiles + slabs + (1 << 20)

    # Row tile: whole batch if it fits in one step, else large tiles (amortize
    # the ~0.35us/step overhead), shrinking to fit the VMEM budget.
    TM = B if B <= 1024 else 1024
    TM = -(-TM // 8) * 8
    while TM > 8 and footprint(TM) > int(vmem_limit * 0.9):
        TM = max(8, TM // 2)
    if TM >= B:
        TM = B                                            # block == full dim is always legal

    num_tiles = pl.cdiv(B, TM)
    kernel = functools.partial(_ntxent_kernel, temperature=float(temperature),
                               batch_len=B, tile_m=TM)

    out = pl.pallas_call(
        kernel,
        out_shape=jax.ShapeDtypeStruct((num_tiles * 8, 128), jnp.float32),
        grid=(num_tiles,),
        in_specs=[
            pl.BlockSpec((TM, E_pad), lambda i: (i, 0)),   # anchor row tile
            pl.BlockSpec((TM, E_pad), lambda i: (i, 0)),   # matching poss rows (diag)
            # Resident normalized poss^T: whole array staged once in VMEM,
            # not pipelined/double-buffered.
            pl.BlockSpec(memory_space=pltpu.MemorySpace.VMEM),
        ],
        out_specs=pl.BlockSpec((8, 128), lambda i: (i, 0)),
        compiler_params=pltpu.CompilerParams(
            dimension_semantics=("parallel",),
            vmem_limit_bytes=int(vmem_limit)),
        cost_estimate=pl.CostEstimate(
            flops=2 * B * B * E_pad,
            transcendentals=B * B,
            bytes_accessed=(2 * B * E_pad * in_bytes
                            + B * E_pad * mxu_bytes
                            + num_tiles * 8 * 128 * 4)),
    )(anchors, poss, poss_nt)

    partial = jnp.sum(out, axis=0)                         # (128,)
    inv_b = 1.0 / B
    return partial[0] * inv_b, partial[1] * inv_b, partial[2] * inv_b


def _ntxent_ref(anchors, poss, temperature=0.25):
    # Pure-JAX reference mirroring the PyTorch loop semantics.
    na = jnp.linalg.norm(anchors, axis=-1, keepdims=True)
    np_ = jnp.linalg.norm(poss, axis=-1, keepdims=True)
    sim = (anchors @ poss.T) / jnp.maximum(na * np_.T, 1e-8)
    B = anchors.shape[0]
    diag = jnp.diagonal(sim)
    num = jnp.exp(diag / temperature)
    den = jnp.sum(jnp.exp(sim / temperature), axis=-1)
    loss = -jnp.log(num / den)
    off = (jnp.sum(sim, axis=-1) - diag) / (B - 1)
    return loss.mean(), diag.mean(), off.mean()


if __name__ == "__main__":
    key = jax.random.PRNGKey(0)
    k1, k2 = jax.random.split(key)
    batch_len, emb = 8, 32
    anchors = jax.random.normal(k1, (batch_len, emb), dtype=jnp.float32)
    poss = jax.random.normal(k2, (batch_len, emb), dtype=jnp.float32)

    loss, cpos, cneg = ntxent(anchors, poss, temperature=0.25)
    jax.block_until_ready((loss, cpos, cneg))

    r_loss, r_cpos, r_cneg = _ntxent_ref(anchors, poss, temperature=0.25)
    assert jnp.allclose(loss, r_loss, atol=1e-4, rtol=1e-4), (loss, r_loss)
    assert jnp.allclose(cpos, r_cpos, atol=1e-4, rtol=1e-4), (cpos, r_cpos)
    assert jnp.allclose(cneg, r_cneg, atol=1e-4, rtol=1e-4), (cneg, r_cneg)

    print("KERNEL_OK")
</pallas_src>

<mosaic_0001>
module attributes {stable_mosaic.version = 11 : i64} {
  func.func @_ntxent_kernel(%arg0: i32, %arg1: memref<8x128xf32, #tpu.memory_space<vmem>>, %arg2: memref<8x128xf32, #tpu.memory_space<vmem>>, %arg3: memref<128x8xf32, #tpu.memory_space<vmem>>, %arg4: memref<8x128xf32, #tpu.memory_space<vmem>>) attributes {dimension_semantics = [#tpu.dimension_semantics<parallel>], iteration_bounds = array<i64: 1>, scalar_prefetch = 0 : i64, scratch_operands = 0 : i64, tpu.core_type = #tpu.core_type<tc>, window_params = [{transform_indices = @transform_0, window_bounds = array<i64: 8, 128>}, {transform_indices = @transform_1, window_bounds = array<i64: 8, 128>}, {pipeline_mode = #tpu.pipeline_mode<synchronous>, transform_indices = @transform_2, window_bounds = array<i64: 128, 8>}, {transform_indices = @transform_3, window_bounds = array<i64: 8, 128>}]} {
    %c0 = arith.constant 0 : index
    %c0_0 = arith.constant 0 : index
    %0 = vector.load %arg1[%c0, %c0_0] : memref<8x128xf32, #tpu.memory_space<vmem>>, vector<8x128xf32>
    %c0_1 = arith.constant 0 : index
    %c0_2 = arith.constant 0 : index
    %1 = vector.load %arg2[%c0_1, %c0_2] : memref<8x128xf32, #tpu.memory_space<vmem>>, vector<8x128xf32>
    %2 = arith.mulf %0, %0 : vector<8x128xf32>
    %cst = arith.constant dense<0.000000e+00> : vector<8xf32>
    %3 = vector.multi_reduction <add>, %2, %cst [1] : vector<8x128xf32> to vector<8xf32>
    %4 = vector.shape_cast %3 : vector<8xf32> to vector<8x1xf32>
    %cst_3 = arith.constant 9.99999993E-9 : f32
    %5 = vector.broadcast %cst_3 : f32 to vector<8x1xf32>
    %6 = arith.maximumf %4, %5 : vector<8x1xf32>
    %7 = math.rsqrt %6 : vector<8x1xf32>
    %8 = vector.broadcast %7 : vector<8x1xf32> to vector<8x128xf32>
    %9 = arith.mulf %0, %8 : vector<8x128xf32>
    %10 = arith.mulf %1, %1 : vector<8x128xf32>
    %cst_4 = arith.constant dense<0.000000e+00> : vector<8xf32>
    %11 = vector.multi_reduction <add>, %10, %cst_4 [1] : vector<8x128xf32> to vector<8xf32>
    %12 = vector.shape_cast %11 : vector<8xf32> to vector<8x1xf32>
    %cst_5 = arith.constant 9.99999993E-9 : f32
    %13 = vector.broadcast %cst_5 : f32 to vector<8x1xf32>
    %14 = arith.maximumf %12, %13 : vector<8x1xf32>
    %15 = math.rsqrt %14 : vector<8x1xf32>
    %16 = vector.broadcast %15 : vector<8x1xf32> to vector<8x128xf32>
    %17 = arith.mulf %1, %16 : vector<8x128xf32>
    %18 = arith.mulf %9, %17 : vector<8x128xf32>
    %cst_6 = arith.constant dense<0.000000e+00> : vector<8xf32>
    %19 = vector.multi_reduction <add>, %18, %cst_6 [1] : vector<8x128xf32> to vector<8xf32>
    %20 = vector.shape_cast %19 : vector<8xf32> to vector<8x1xf32>
    %cst_7 = arith.constant 4.000000e+00 : f32
    %21 = vector.broadcast %cst_7 : f32 to vector<8x128xf32>
    %22 = arith.mulf %9, %21 : vector<8x128xf32>
    %c0_8 = arith.constant 0 : index
    %c0_9 = arith.constant 0 : index
    %23 = vector.load %arg3[%c0_8, %c0_9] : memref<128x8xf32, #tpu.memory_space<vmem>>, vector<128x8xf32>
    %cst_10 = arith.constant dense<0.000000e+00> : vector<8x8xf32>
    %24 = tpu.matmul %22, %23, %cst_10 {dimension_numbers = #tpu.dot_dimension_numbers<[1], [0], [0], [1], [0, 0, 1, 1], [], []>} : vector<8x128xf32>, vector<128x8xf32>, vector<8x8xf32> -> vector<8x8xf32>
    %25 = math.exp %24 : vector<8x8xf32>
    %cst_11 = arith.constant dense<0.000000e+00> : vector<8xf32>
    %26 = vector.multi_reduction <add>, %25, %cst_11 [1] : vector<8x8xf32> to vector<8xf32>
    %27 = vector.shape_cast %26 : vector<8xf32> to vector<8x1xf32>
    %28 = math.log %27 : vector<8x1xf32>
    %cst_12 = arith.constant 4.000000e+00 : f32
    %29 = vector.broadcast %cst_12 : f32 to vector<8x1xf32>
    %30 = arith.mulf %20, %29 : vector<8x1xf32>
    %31 = arith.subf %28, %30 : vector<8x1xf32>
    %cst_13 = arith.constant dense<0.000000e+00> : vector<8xf32>
    %32 = vector.multi_reduction <add>, %24, %cst_13 [1] : vector<8x8xf32> to vector<8xf32>
    %33 = vector.shape_cast %32 : vector<8xf32> to vector<8x1xf32>
    %cst_14 = arith.constant 2.500000e-01 : f32
    %34 = vector.broadcast %cst_14 : f32 to vector<8x1xf32>
    %35 = arith.mulf %33, %34 : vector<8x1xf32>
    %36 = arith.subf %35, %20 : vector<8x1xf32>
    %cst_15 = arith.constant 0.142857149 : f32
    %37 = vector.broadcast %cst_15 : f32 to vector<8x1xf32>
    %38 = arith.mulf %36, %37 : vector<8x1xf32>
    %39 = vector.shape_cast %31 : vector<8x1xf32> to vector<1x8x1xf32>
    %cst_16 = arith.constant dense<0.000000e+00> : vector<1xf32>
    %40 = vector.multi_reduction <add>, %39, %cst_16 [1, 2] : vector<1x8x1xf32> to vector<1xf32>
    %41 = vector.shape_cast %40 : vector<1xf32> to vector<1x1x1xf32>
    %42 = vector.extract %41[0, 0, 0] : f32 from vector<1x1x1xf32>
    %43 = vector.shape_cast %20 : vector<8x1xf32> to vector<1x8x1xf32>
    %cst_17 = arith.constant dense<0.000000e+00> : vector<1xf32>
    %44 = vector.multi_reduction <add>, %43, %cst_17 [1, 2] : vector<1x8x1xf32> to vector<1xf32>
    %45 = vector.shape_cast %44 : vector<1xf32> to vector<1x1x1xf32>
    %46 = vector.extract %45[0, 0, 0] : f32 from vector<1x1x1xf32>
    %47 = vector.shape_cast %38 : vector<8x1xf32> to vector<1x8x1xf32>
    %cst_18 = arith.constant dense<0.000000e+00> : vector<1xf32>
    %48 = vector.multi_reduction <add>, %47, %cst_18 [1, 2] : vector<1x8x1xf32> to vector<1xf32>
    %49 = vector.shape_cast %48 : vector<1xf32> to vector<1x1x1xf32>
    %50 = vector.extract %49[0, 0, 0] : f32 from vector<1x1x1xf32>
    %51 = tpu.iota {dimensions = array<i32: 0>} : vector<8x128xi32>
    %52 = tpu.iota {dimensions = array<i32: 1>} : vector<8x128xi32>
    %c0_i32 = arith.constant 0 : i32
    %53 = vector.broadcast %c0_i32 : i32 to vector<8x128xi32>
    %54 = arith.cmpi eq, %51, %53 : vector<8x128xi32>
    %c0_i32_19 = arith.constant 0 : i32
    %55 = vector.broadcast %c0_i32_19 : i32 to vector<8x128xi32>
    %56 = arith.cmpi eq, %52, %55 : vector<8x128xi32>
    %57 = arith.andi %54, %56 : vector<8x128xi1>
    %cst_20 = arith.constant 0.000000e+00 : f32
    %58 = vector.broadcast %42 : f32 to vector<8x128xf32>
    %59 = vector.broadcast %cst_20 : f32 to vector<8x128xf32>
    %60 = arith.select %57, %58, %59 : vector<8x128xi1>, vector<8x128xf32>
    %c1_i32 = arith.constant 1 : i32
    %61 = vector.broadcast %c1_i32 : i32 to vector<8x128xi32>
    %62 = arith.cmpi eq, %52, %61 : vector<8x128xi32>
    %63 = arith.andi %54, %62 : vector<8x128xi1>
    %cst_21 = arith.constant 0.000000e+00 : f32
    %64 = vector.broadcast %46 : f32 to vector<8x128xf32>
    %65 = vector.broadcast %cst_21 : f32 to vector<8x128xf32>
    %66 = arith.select %63, %64, %65 : vector<8x128xi1>, vector<8x128xf32>
    %67 = arith.addf %60, %66 : vector<8x128xf32>
    %c2_i32 = arith.constant 2 : i32
    %68 = vector.broadcast %c2_i32 : i32 to vector<8x128xi32>
    %69 = arith.cmpi eq, %52, %68 : vector<8x128xi32>
    %70 = arith.andi %54, %69 : vector<8x128xi1>
    %cst_22 = arith.constant 0.000000e+00 : f32
    %71 = vector.broadcast %50 : f32 to vector<8x128xf32>
    %72 = vector.broadcast %cst_22 : f32 to vector<8x128xf32>
    %73 = arith.select %70, %71, %72 : vector<8x128xi1>, vector<8x128xf32>
    %74 = arith.addf %67, %73 : vector<8x128xf32>
    %c0_23 = arith.constant 0 : index
    %c0_24 = arith.constant 0 : index
    %75 = vector.load %arg4[%c0_23, %c0_24] : memref<8x128xf32, #tpu.memory_space<vmem>>, vector<8x128xf32>
    tpu.vector_store %arg4[%c0_23, %c0_24], %74 {strides = array<i32>} : memref<8x128xf32, #tpu.memory_space<vmem>>, vector<8x128xf32>,
    return
  }
  func.func @transform_0(%arg0: i32) -> (i32, i32) {
    %c0_i32 = arith.constant 0 : i32
    %c0_i32_0 = arith.constant 0 : i32
    return %arg0, %c0_i32 : i32, i32
  }
  func.func @transform_1(%arg0: i32) -> (i32, i32) {
    %c0_i32 = arith.constant 0 : i32
    %c0_i32_0 = arith.constant 0 : i32
    return %arg0, %c0_i32 : i32, i32
  }
  func.func @transform_2(%arg0: i32) -> (i32, i32) {
    %c0_i32 = arith.constant 0 : i32
    %c0_i32_0 = arith.constant 0 : i32
    %c0_i32_1 = arith.constant 0 : i32
    return %c0_i32, %c0_i32_0 : i32, i32
  }
  func.func @transform_3(%arg0: i32) -> (i32, i32) {
    %c0_i32 = arith.constant 0 : i32
    %c0_i32_0 = arith.constant 0 : i32
    return %arg0, %c0_i32 : i32, i32
  }
}

</mosaic_0001>

<bundles_post_ra>
// kernel: tpu_custom_call.1
= control target key start
LH: loop header
LB: loop body
LE: loop exit
PB: predicated region body
PF: predicated region fallthrough
CT: control target
= control target key end

     0   :  { %v318_v4 = vmov 0.0|0.0   ;;  %s413_s0 = inlined_call_operand.vmem [shape: f32[8,128], index: 0, kind: input, shape index: {}]   ;;  %s414_s1 = inlined_call_operand.vmem [shape: f32[8,128], index: 1, kind: input, shape index: {}]   ;;  %s415_s2 = inlined_call_operand.vmem [shape: f32[128,8], index: 2, kind: input, shape index: {}]   ;;  %s416_s3 = inlined_call_operand.hbm [shape: f32[8,128], index: 3, kind: output, shape index: {}]  }
   0x1   :  { %v15_v0 = vld [vmem:[%s413_s0] sm:$0xff]  ;;  %252 = vmatprep.subr.bf16.mxu0 %v318_v4  ;;  %v34_v5 = vld [vmem:[%s415_s2 + $0x8] sm:$0xff]  ;;  %v35_v6 = vld [vmem:[%s415_s2 + $0x10] sm:$0xff] }
   0x2   :  { %v348_v1 = vld [vmem:[%s414_s1] sm:$0xff]  ;;  %v17_v3 = vmul.f32 %v15_v0, %v15_v0  ;;  %v36_v7 = vld [vmem:[%s415_s2 + $0x18] sm:$0xff] }
   0x3   :  { %v33_v2 = vld [vmem:[%s415_s2] sm:$0xff]  ;;  %v23_v9 = vmul.f32 %v348_v1, %v348_v1 }
   0x4   :  { %v253_v8 = vpack.c.bf16 %v34_v5, %v33_v2  ;;  %18 = vadd.xlane.f32.xlu0 %v17_v3 }
   0x5   :  { %8 = vsyncpa [#allocation3], 0  ;;  %v256_v10 = vpack.c.bf16 %v36_v7, %v35_v6  ;;  %v37_v11 = vld [vmem:[%s415_s2 + $0x20] sm:$0xff]  ;;  %v38_v12 = vld [vmem:[%s415_s2 + $0x28] sm:$0xff]  ;;  %vm319_vm0 = vmmov 0   ;;  %v320_v26 = vmov 0.0  }
   0x6   :  { %254 = vmatpush3.bf16.msra.mxu0 %v253_v8  ;;  %v259_v13 = vpack.c.bf16 %v38_v12, %v37_v11  ;;  %v39_v14 = vld [vmem:[%s415_s2 + $0x30] sm:$0xff]  ;;  %v40_v15 = vld [vmem:[%s415_s2 + $0x38] sm:$0xff]  ;;  %v41_v17 = vld [vmem:[%s415_s2 + $0x40] sm:$0xff]  ;;  %249 = vmatprep.mubr.msk.f32.mxu0 %vm319_vm0, %v320_v26  ;;  %vm121_vm1 = vcmask 64512   ;;  %vm135_vm2 = vcmask 7168   ;;  %s321_s21 = smov [#allocation2]  }
   0x7   :  { %255 = vmatprep.subr.bf16.mxu0 %v318_v4  ;;  %v262_v16 = vpack.c.bf16 %v40_v15, %v39_v14  ;;  %v42_v18 = vld [vmem:[%s415_s2 + $0x48] sm:$0xff]  ;;  %v43_v20 = vld [vmem:[%s415_s2 + $0x50] sm:$0xff]  ;;  %v44_v21 = vld [vmem:[%s415_s2 + $0x58] sm:$0xff]  ;;  %s192_s0 = sshll.u32 %s321_s21, 4  ;;  %s193_s0 = int_to_ptr.vmem [resolvable:$true] %s192_s0 }
   0x8   :  { %24 = vadd.xlane.f32.xlu0 %v23_v9  ;;  %v265_v19 = vpack.c.bf16 %v42_v18, %v41_v17  ;;  %v268_v22 = vpack.c.bf16 %v44_v21, %v43_v20  ;;  %v45_v23 = vld [vmem:[%s415_s2 + $0x60] sm:$0xff]  ;;  %v46_v24 = vld [vmem:[%s415_s2 + $0x68] sm:$0xff]  ;;  %v47_v27 = vld [vmem:[%s415_s2 + $0x70] sm:$0xff]  ;;  %s294_s22 = scalar_lea.vmem %s193_s0, 128  ;;  %p299_p1 = scmp.lt.s32.totalorder %s193_s0, %s193_s0 }
   0x9   :  { %v271_v25 = vpack.c.bf16 %v46_v24, %v45_v23  ;;  %v48_v28 = vld [vmem:[%s415_s2 + $0x78] sm:$0xff]  ;;  %p295_p0 = scmp.ne.s32.totalorder %s193_s0, %s294_s22  ;;  %p300_p2 = scmp.lt.s32.totalorder %s294_s22, %s294_s22 }
   0xa   :  { %257 = vmatpush3.bf16.msra.mxu0 %v256_v10  ;;  %v274_v29 = vpack.c.bf16 %v48_v28, %v47_v27 }
   0xb   :  { %258 = vmatprep.subr.bf16.mxu0 %v318_v4  ;;  %p301_p3 = por %p300_p2, %p299_p1 }
   0xd   :  { %p302_p4 = pnand %p301_p3, %p295_p0 }
   0xe   :  { %260 = vmatpush3.bf16.msra.mxu0 %v259_v13 }
   0xf   :  { %261 = vmatprep.subr.bf16.mxu0 %v318_v4 }
  0x12   :  { %263 = vmatpush3.bf16.msra.mxu0 %v262_v16  ;;  %v166_v16 = vlaneseq }
  0x13   :  { %264 = vmatprep.subr.bf16.mxu0 %v318_v4 }
  0x14   :  { %v167_v17 = vshrl.u32 %v166_v16, 7  ;;  %v169_v18 = vand.u32 127, %v166_v16 }
  0x16   :  { %266 = vmatpush3.bf16.msra.mxu0 %v265_v19  ;;  %vm170_vm3 = vcmp.eq.s32.totalorder %v167_v17, 0  ;;  %vm171_vm4 = vcmp.eq.s32.totalorder %v169_v18, 0  ;;  %vm175_vm5 = vcmp.eq.s32.totalorder %v169_v18, 1  ;;  %vm180_vm8 = vcmp.eq.s32.totalorder %v169_v18, 2 }
  0x17   :  { %267 = vmatprep.subr.bf16.mxu0 %v318_v4  ;;  %vm172_vm6 = vmand %vm170_vm3, %vm171_vm4 }
  0x18   :  { %vm176_vm7 = vmand %vm170_vm3, %vm175_vm5 }
  0x19   :  { %vm181_vm9 = vmand %vm170_vm3, %vm180_vm8 }
  0x1a   :  { %269 = vmatpush3.bf16.msra.mxu0 %v268_v22 }
  0x1b   :  { %270 = vmatprep.subr.bf16.mxu0 %v318_v4 }
  0x1e   :  { %272 = vmatpush3.bf16.msra.mxu0 %v271_v25 }
  0x1f   :  { %273 = vmatprep.subr.bf16.mxu0 %v318_v4 }
  0x22   :  { %275 = vmatpush3.bf16.msra.mxu0 %v274_v29 }
  0x91   :  { %v19_v30 = vpop.xlane.xlu0 %18 }
  0x92   :  { %v20_v31 = vmax.f32 %v19_v30, 1e-08 }
  0x94   :  { %286 = vrsqrt.f32 %v20_v31 }
  0x95   :  { %v25_v35 = vpop.xlane.xlu0 %24 }
  0x96   :  { %v26_v36 = vmax.f32 %v25_v35, 1e-08 }
  0x98   :  { %288 = vrsqrt.f32 %v26_v36 }
  0x9e   :  { %v287_v32 = vpop.eup %286 }
  0x9f   :  { %v22_v33 = vmul.f32 %v287_v32, %v15_v0 }
  0xa1   :  { %v32_v34 = vmul.f32 4.0, %v22_v33 }
  0xa2   :  { %v289_v41 = vpop.eup %288 }
  0xa3   :  { %250 = vmatmul.mubr.f32.vlgmr.msra.gmra.mrb[0].mxu0 %v32_v34  ;;  %v28_v43 = vmul.f32 %v289_v41, %v348_v1 }
  0xa5   :  { %v29_v45 = vmul.f32 %v28_v43, %v22_v33 }
 0x176   :  { %v115_v37 = vpop.f32.mrb[0].mxu0 }
 0x177   :  { %v119_v38 = vmul.f32 1.442695, %v115_v37  ;;  %v251_v39 = vpop.f32.mrb[1].mxu0  ;;  %v129_v40 = vsel %vm121_vm1, %v115_v37, 0.0 }
 0x178   :  { %130 = vadd.xlane.f32.xlu0 %v129_v40 }
 0x179   :  { %290 = vpow2.f32 %v119_v38 }
 0x183   :  { %v291_v42 = vpop.eup %290 }
 0x184   :  { %v122_v44 = vsel %vm121_vm1, %v291_v42, 0.0 }
 0x185   :  { %123 = vadd.xlane.f32.xlu1 %v122_v44 }
 0x189   :  { %30 = vadd.xlane.f32.xlu1 %v29_v45 }
 0x205   :  { %v131_v49 = vpop.xlane.xlu0 %130 }
 0x206   :  { %v132_v50 = vmul.f32 0.25, %v131_v49 }
 0x212   :  { %v124_v46 = vpop.xlane.xlu1 %123 }
 0x213   :  { %292 = vlog2.f32 %v124_v46 }
 0x216   :  { %v31_v47 = vpop.xlane.xlu1 %30 }
 0x217   :  { %v146_v48 = vsel %vm135_vm2, %v31_v47, 0.0  ;;  %v127_v53 = vmul.f32 4.0, %v31_v47  ;;  %v133_v54 = vsub.f32 %v132_v50, %v31_v47 }
 0x218   :  { %147 = vadd.xlane.f32.xlu0 %v146_v48 }
 0x219   :  { %v134_v57 = vmul.f32 0.14285715, %v133_v54 }
 0x21b   :  { %v156_v58 = vsel %vm135_vm2, %v134_v57, 0.0 }
 0x21d   :  { %v293_v51 = vpop.eup %292 }
 0x21e   :  { %v126_v52 = vmul.f32 0.6931472, %v293_v51 }
 0x220   :  { %v128_v55 = vsub.f32 %v126_v52, %v127_v53 }
 0x222   :  { %v136_v56 = vsel %vm135_vm2, %v128_v55, 0.0 }
 0x223   :  { %137 = vadd.xlane.f32.xlu1 %v136_v56 }
 0x227   :  { %157 = vadd.xlane.f32.xlu1 %v156_v58 }
 0x2a5   :  { %v148_v59 = vpop.xlane.xlu0 %147 }
 0x2a6   :  { %v149_v60 = vrot.slane %v148_v59, 4 }
 0x2a8   :  { %v150_v61 = vadd.f32 %v149_v60, %v148_v59 }
 0x2aa   :  { %v151_v62 = vrot.slane %v150_v61, 2 }
 0x2ac   :  { %v152_v2 = vadd.f32 %v151_v62, %v150_v61 }
 0x2ae   :  { %v153_v8 = vrot.slane %v152_v2, 1 }
 0x2b0   :  { %v138_v63 = vpop.xlane.xlu1 %137  ;;  %v154_v13 = vadd.f32 %v153_v8, %v152_v2 }
 0x2b1   :  { %v139_v0 = vrot.slane %v138_v63, 4 }
 0x2b3   :  { %v140_v1 = vadd.f32 %v139_v0, %v138_v63 }
 0x2b4   :  { %v158_v3 = vpop.xlane.xlu1 %157 }
 0x2b5   :  { %v141_v4 = vrot.slane %v140_v1, 2  ;;  %v159_v5 = vrot.slane %v158_v3, 4 }
 0x2b7   :  { %v160_v6 = vadd.f32 %v159_v5, %v158_v3  ;;  %v142_v7 = vadd.f32 %v141_v4, %v140_v1 }
 0x2b9   :  { %v161_v9 = vrot.slane %v160_v6, 2  ;;  %v143_v10 = vrot.slane %v142_v7, 1 }
 0x2bb   :  { %v162_v11 = vadd.f32 %v161_v9, %v160_v6  ;;  %v144_v12 = vadd.f32 %v143_v10, %v142_v7 }
 0x2bd   :  { %276 = vpush %v144_v12  ;;  %v163_v14 = vrot.slane %v162_v11, 1 }
 0x2be   :  { %278 = vpush %v154_v13 }
 0x2bf   :  { %v164_v15 = vadd.f32 %v163_v14, %v162_v11 }
 0x2c1   :  { %280 = vpush %v164_v15 }
 0x2ee   :  { %s277_s2 = spop %276 }
 0x2ef   :  { %v173_v19 = vstv %s277_s2  ;;  %s279_s19 = spop %278 }
 0x2f0   :  { %v174_v20 = vsel %vm172_vm6, %v173_v19, 0.0  ;;  %v177_v21 = vstv %s279_s19 }
 0x2f1   :  { %v178_v22 = vsel %vm176_vm7, %v177_v21, 0.0 }
 0x2f2   :  { %s281_s20 = spop %280  ;;  %v179_v23 = vadd.f32 %v178_v22, %v174_v20 }
 0x2f3   :  { %v182_v24 = vstv %s281_s20 }
 0x2f4   :  { %v183_v25 = vsel %vm181_vm9, %v182_v24, 0.0 }
 0x2f5   :  { %v184_v26 = vadd.f32 %v183_v25, %v179_v23 }
 0x2f7   :  { %185 = vst [vmem:[#allocation2] sm:$0xff] %v184_v26 }
 0x2f8   :  { %305 = shalt.err (!%p302_p4)
}
 0x2f9   :  { %s306_s24 = scalar_lea.hbm %s416_s3, 128 }
 0x2fa   :  { %p307_p5 = scmp.ne.s32.totalorder %s416_s3, %s306_s24  ;;  %p310_p6 = scmp.lt.u32.totalorder %s306_s24, %s416_s3 }
 0x2fc   :  { %p312_p7 = pnand %p310_p6, %p307_p5 }
 0x2fe   :  { %315 = shalt.err (!%p312_p7)
}
 0x2ff   :  { %195 = dma.vmem_to_hbm [thread:$0]  %s193_s0, 128, %s416_s3, [#allocation3]  }
 0x300   :  { %316 = dma.done.wait [#allocation3], 128  }
 0x301   :  { %317 = vsyncadd [#allocation3], 4294967168 }
 0x302   :  { %199 = vsyncpa [#allocation3], 1 }

</bundles_post_ra>
